<compile_context>
chip_gen: v6e
topology: v6e:2x2x1
jax: 0.10.0
libtpu: 0.0.40
codegen_flags: <defaults>
</compile_context>

<pallas_src>
import functools

import jax
import jax.numpy as jnp
from jax.experimental import pallas as pl
from jax.experimental.pallas import tpu as pltpu


def _cls_head_kernel(x_ref, gamma_ref, beta_ref, w_ref, b_ref, out_ref, *, eps):
    """One grid step: one batch tile.

    x_ref:     (tb, N, D)   input tokens
    gamma_ref: (1, D)       LayerNorm weight
    beta_ref:  (1, D)       LayerNorm bias
    w_ref:     (D, C)       classifier weight (x @ W convention)
    b_ref:     (1, C)       classifier bias
    out_ref:   (tb, C)      logits
    """
    x = x_ref[...].astype(jnp.float32)            # (tb, N, D)

    # Reduce('b n d -> b d', 'mean')
    pooled = jnp.mean(x, axis=1)                  # (tb, D)

    # LayerNorm over D (biased variance, like torch.nn.LayerNorm).
    mu = jnp.mean(pooled, axis=-1, keepdims=True)         # (tb, 1)
    xc = pooled - mu
    var = jnp.mean(xc * xc, axis=-1, keepdims=True)       # (tb, 1)
    inv = jax.lax.rsqrt(var + eps)                         # EUP
    normed = xc * inv * gamma_ref[...] + beta_ref[...]     # (tb, D)

    # Linear(D -> C): single MXU matmul, f32 accumulation, straight to out_ref.
    out_ref[...] = (
        jnp.dot(normed, w_ref[...], preferred_element_type=jnp.float32)
        + b_ref[...]
    ).astype(out_ref.dtype)


def _pick_batch_tile(B):
    if B <= 8:
        return B
    for tb in (512, 256, 128, 64, 32, 16, 8):
        if B % tb == 0:
            return tb
    return B  # fall back: one grid step over the full batch


def classification_head(x, gamma, beta, w, b, *, eps=1e-5):
    """x: (B, N, D); gamma/beta: (D,); w: (D, C); b: (C,). Returns (B, C) f32."""
    B, N, D = x.shape
    C = w.shape[1]
    tb = _pick_batch_tile(B)

    gamma2 = gamma.reshape(1, D).astype(jnp.float32)
    beta2 = beta.reshape(1, D).astype(jnp.float32)
    b2 = b.reshape(1, C).astype(jnp.float32)

    kernel = functools.partial(_cls_head_kernel, eps=eps)

    grid_spec = pltpu.PrefetchScalarGridSpec(
        num_scalar_prefetch=0,
        grid=(B // tb,),
        in_specs=[
            pl.BlockSpec((tb, N, D), lambda i: (i, 0, 0)),   # x (per batch tile)
            pl.BlockSpec((1, D), lambda i: (0, 0)),          # gamma (resident)
            pl.BlockSpec((1, D), lambda i: (0, 0)),          # beta  (resident)
            pl.BlockSpec((D, C), lambda i: (0, 0)),          # W     (resident)
            pl.BlockSpec((1, C), lambda i: (0, 0)),          # bias  (resident)
        ],
        out_specs=pl.BlockSpec((tb, C), lambda i: (i, 0)),
    )

    return pl.pallas_call(
        kernel,
        out_shape=jax.ShapeDtypeStruct((B, C), jnp.float32),
        grid_spec=grid_spec,
        compiler_params=pltpu.CompilerParams(
            dimension_semantics=("parallel",)),
    )(x, gamma2, beta2, w, b2)


def reference_head(x, gamma, beta, w, b, *, eps=1e-5):
    pooled = jnp.mean(x, axis=1)
    mu = jnp.mean(pooled, axis=-1, keepdims=True)
    var = jnp.mean((pooled - mu) ** 2, axis=-1, keepdims=True)
    normed = (pooled - mu) / jnp.sqrt(var + eps) * gamma + beta
    return normed @ w + b


if __name__ == "__main__":
    B, N, D = 2, 8, 32          # batch, tokens (seq), d_model
    num_classes = 10

    key = jax.random.PRNGKey(0)
    ks = jax.random.split(key, 5)

    x = jax.random.normal(ks[0], (B, N, D), jnp.float32)

    # LayerNorm params (torch default init: weight=1, bias=0 — use random
    # affine here to actually exercise the math).
    gamma = 1.0 + 0.1 * jax.random.normal(ks[1], (D,), jnp.float32)
    beta = 0.1 * jax.random.normal(ks[2], (D,), jnp.float32)

    # Linear(D, num_classes) params, stored as (D, C) for the x @ W convention.
    bound = D ** -0.5
    w = jax.random.uniform(ks[3], (D, num_classes), jnp.float32, -bound, bound)
    b = jax.random.uniform(ks[4], (num_classes,), jnp.float32, -bound, bound)

    out = classification_head(x, gamma, beta, w, b)
    out = jax.block_until_ready(out)

    ref = reference_head(x, gamma, beta, w, b)
    assert out.shape == (B, num_classes)
    assert jnp.allclose(out, ref, atol=1e-5, rtol=1e-5), "mismatch vs reference"

    print("KERNEL_OK")
</pallas_src>

<mosaic_0001>
module attributes {stable_mosaic.version = 11 : i64} {
  func.func @_cls_head_kernel(%arg0: i32, %arg1: memref<2x8x32xf32, #tpu.memory_space<vmem>>, %arg2: memref<1x32xf32, #tpu.memory_space<vmem>>, %arg3: memref<1x32xf32, #tpu.memory_space<vmem>>, %arg4: memref<32x10xf32, #tpu.memory_space<vmem>>, %arg5: memref<1x10xf32, #tpu.memory_space<vmem>>, %arg6: memref<2x10xf32, #tpu.memory_space<vmem>>) attributes {dimension_semantics = [#tpu.dimension_semantics<parallel>], iteration_bounds = array<i64: 1>, scalar_prefetch = 0 : i64, scratch_operands = 0 : i64, tpu.core_type = #tpu.core_type<tc>, window_params = [{transform_indices = @transform_0, window_bounds = array<i64: 2, 8, 32>}, {pipeline_mode = #tpu.pipeline_mode<synchronous>, transform_indices = @transform_1, window_bounds = array<i64: 1, 32>}, {pipeline_mode = #tpu.pipeline_mode<synchronous>, transform_indices = @transform_2, window_bounds = array<i64: 1, 32>}, {pipeline_mode = #tpu.pipeline_mode<synchronous>, transform_indices = @transform_3, window_bounds = array<i64: 32, 10>}, {pipeline_mode = #tpu.pipeline_mode<synchronous>, transform_indices = @transform_4, window_bounds = array<i64: 1, 10>}, {transform_indices = @transform_5, window_bounds = array<i64: 2, 10>}]} {
    %c0 = arith.constant 0 : index
    %c0_0 = arith.constant 0 : index
    %c0_1 = arith.constant 0 : index
    %0 = vector.load %arg1[%c0, %c0_0, %c0_1] : memref<2x8x32xf32, #tpu.memory_space<vmem>>, vector<2x8x32xf32>
    %cst = arith.constant dense<0.000000e+00> : vector<2x32xf32>
    %1 = vector.multi_reduction <add>, %0, %cst [1] : vector<2x8x32xf32> to vector<2x32xf32>
    %cst_2 = arith.constant 8.000000e+00 : f32
    %2 = vector.broadcast %cst_2 : f32 to vector<2x32xf32>
    %3 = arith.divf %1, %2 : vector<2x32xf32>
    %cst_3 = arith.constant dense<0.000000e+00> : vector<2xf32>
    %4 = vector.multi_reduction <add>, %3, %cst_3 [1] : vector<2x32xf32> to vector<2xf32>
    %5 = vector.shape_cast %4 : vector<2xf32> to vector<2x1xf32>
    %cst_4 = arith.constant 3.200000e+01 : f32
    %6 = vector.broadcast %cst_4 : f32 to vector<2x1xf32>
    %7 = arith.divf %5, %6 : vector<2x1xf32>
    %8 = vector.broadcast %7 : vector<2x1xf32> to vector<2x32xf32>
    %9 = arith.subf %3, %8 : vector<2x32xf32>
    %10 = arith.mulf %9, %9 : vector<2x32xf32>
    %cst_5 = arith.constant dense<0.000000e+00> : vector<2xf32>
    %11 = vector.multi_reduction <add>, %10, %cst_5 [1] : vector<2x32xf32> to vector<2xf32>
    %12 = vector.shape_cast %11 : vector<2xf32> to vector<2x1xf32>
    %cst_6 = arith.constant 3.200000e+01 : f32
    %13 = vector.broadcast %cst_6 : f32 to vector<2x1xf32>
    %14 = arith.divf %12, %13 : vector<2x1xf32>
    %cst_7 = arith.constant 9.99999974E-6 : f32
    %15 = vector.broadcast %cst_7 : f32 to vector<2x1xf32>
    %16 = arith.addf %14, %15 : vector<2x1xf32>
    %17 = math.rsqrt %16 : vector<2x1xf32>
    %18 = vector.broadcast %17 : vector<2x1xf32> to vector<2x32xf32>
    %19 = arith.mulf %9, %18 : vector<2x32xf32>
    %c0_8 = arith.constant 0 : index
    %c0_9 = arith.constant 0 : index
    %20 = vector.load %arg2[%c0_8, %c0_9] : memref<1x32xf32, #tpu.memory_space<vmem>>, vector<1x32xf32>
    %21 = vector.broadcast %20 : vector<1x32xf32> to vector<2x32xf32>
    %22 = arith.mulf %19, %21 : vector<2x32xf32>
    %c0_10 = arith.constant 0 : index
    %c0_11 = arith.constant 0 : index
    %23 = vector.load %arg3[%c0_10, %c0_11] : memref<1x32xf32, #tpu.memory_space<vmem>>, vector<1x32xf32>
    %24 = vector.broadcast %23 : vector<1x32xf32> to vector<2x32xf32>
    %25 = arith.addf %22, %24 : vector<2x32xf32>
    %c0_12 = arith.constant 0 : index
    %c0_13 = arith.constant 0 : index
    %26 = vector.load %arg4[%c0_12, %c0_13] : memref<32x10xf32, #tpu.memory_space<vmem>>, vector<32x10xf32>
    %cst_14 = arith.constant dense<0.000000e+00> : vector<2x10xf32>
    %27 = tpu.matmul %25, %26, %cst_14 {dimension_numbers = #tpu.dot_dimension_numbers<[1], [0], [0], [1], [0, 0, 1, 1], [], []>} : vector<2x32xf32>, vector<32x10xf32>, vector<2x10xf32> -> vector<2x10xf32>
    %c0_15 = arith.constant 0 : index
    %c0_16 = arith.constant 0 : index
    %28 = vector.load %arg5[%c0_15, %c0_16] : memref<1x10xf32, #tpu.memory_space<vmem>>, vector<1x10xf32>
    %29 = vector.broadcast %28 : vector<1x10xf32> to vector<2x10xf32>
    %30 = arith.addf %27, %29 : vector<2x10xf32>
    %c0_17 = arith.constant 0 : index
    %c0_18 = arith.constant 0 : index
    %31 = vector.load %arg6[%c0_17, %c0_18] : memref<2x10xf32, #tpu.memory_space<vmem>>, vector<2x10xf32>
    tpu.vector_store %arg6[%c0_17, %c0_18], %30 {strides = array<i32>} : memref<2x10xf32, #tpu.memory_space<vmem>>, vector<2x10xf32>,
    return
  }
  func.func @transform_0(%arg0: i32) -> (i32, i32, i32) {
    %c0_i32 = arith.constant 0 : i32
    %c0_i32_0 = arith.constant 0 : i32
    %c0_i32_1 = arith.constant 0 : i32
    return %arg0, %c0_i32, %c0_i32_0 : i32, i32, i32
  }
  func.func @transform_1(%arg0: i32) -> (i32, i32) {
    %c0_i32 = arith.constant 0 : i32
    %c0_i32_0 = arith.constant 0 : i32
    %c0_i32_1 = arith.constant 0 : i32
    return %c0_i32, %c0_i32_0 : i32, i32
  }
  func.func @transform_2(%arg0: i32) -> (i32, i32) {
    %c0_i32 = arith.constant 0 : i32
    %c0_i32_0 = arith.constant 0 : i32
    %c0_i32_1 = arith.constant 0 : i32
    return %c0_i32, %c0_i32_0 : i32, i32
  }
  func.func @transform_3(%arg0: i32) -> (i32, i32) {
    %c0_i32 = arith.constant 0 : i32
    %c0_i32_0 = arith.constant 0 : i32
    %c0_i32_1 = arith.constant 0 : i32
    return %c0_i32, %c0_i32_0 : i32, i32
  }
  func.func @transform_4(%arg0: i32) -> (i32, i32) {
    %c0_i32 = arith.constant 0 : i32
    %c0_i32_0 = arith.constant 0 : i32
    %c0_i32_1 = arith.constant 0 : i32
    return %c0_i32, %c0_i32_0 : i32, i32
  }
  func.func @transform_5(%arg0: i32) -> (i32, i32) {
    %c0_i32 = arith.constant 0 : i32
    %c0_i32_0 = arith.constant 0 : i32
    return %arg0, %c0_i32 : i32, i32
  }
}

</mosaic_0001>

<bundles_post_ra>
// kernel: tpu_custom_call.1
= control target key start
LH: loop header
LB: loop body
LE: loop exit
PB: predicated region body
PF: predicated region fallthrough
CT: control target
= control target key end

     0   :  { %vm23_vm0 = vcmask 261120   ;;  %s314_s0 = inlined_call_operand.vmem [shape: f32[2,8,32], index: 0, kind: input, shape index: {}]   ;;  %s315_s1 = inlined_call_operand.vmem [shape: f32[1,32], index: 1, kind: input, shape index: {}]   ;;  %s316_s2 = inlined_call_operand.vmem [shape: f32[1,32], index: 2, kind: input, shape index: {}]   ;;  %s317_s3 = inlined_call_operand.vmem [shape: f32[32,10], index: 3, kind: input, shape index: {}]   ;;  %s318_s4 = inlined_call_operand.vmem [shape: f32[1,10], index: 4, kind: input, shape index: {}]   ;;  %s319_s5 = inlined_call_operand.hbm [shape: f32[2,10], index: 5, kind: output, shape index: {}]  }
   0x1   :  { %v21_v0 = vld [vmem:[%s314_s0] sm:$0xff]  ;;  %v22_v1 = vld [vmem:[%s314_s0 + $0x8] sm:$0xff] }
   0x2   :  { %v24_v2 = vsel %vm23_vm0, %v21_v0, 0.0  ;;  %v31_v3 = vsel %vm23_vm0, %v22_v1, 0.0 }
   0x3   :  { %10 = vsyncpa [#allocation3], 0  ;;  %v25_v4 = vrot.slane %v24_v2, 4  ;;  %v32_v5 = vrot.slane %v31_v3, 4  ;;  %vm43_vm1 = vcmask 1041409   ;;  %vm46_vm2 = vcmask 254976  }
   0x4   :  { %v98_v30 = vld [vmem:[%s317_s3 + $0x18] sm:$0xff]  ;;  %v245_v31 = vmov 0.0   ;;  %v97_v32 = vld [vmem:[%s317_s3 + $0x10] sm:$0xff]  ;;  %vm246_vm3 = vmmov 0   ;;  %v96_v33 = vld [vmem:[%s317_s3 + $0x8] sm:$0xff]  ;;  %s247_s9 = smov [#allocation2]  }
   0x5   :  { %v26_v6 = vadd.f32 %v25_v4, %v24_v2  ;;  %v33_v7 = vadd.f32 %v32_v5, %v31_v3  ;;  %207 = vmatprep.subr.mxu0 %v245_v31  ;;  %215 = vmatprep.mubr.msk.f32.mxu0 %vm246_vm3, %v245_v31  ;;  %v95_v34 = vld [vmem:[%s317_s3] sm:$0xff]  ;;  %vm182_vm4 = vcmask 74752  }
   0x6   :  { %208 = vmatpush3.msra.mxu0 %v98_v30  ;;  %v198_v41 = vld [vmem:[%s315_s1] ss:$0 sm:$0xff]  ;;  %s190_s1 = sshll.u32 %s247_s9, 4  ;;  %s191_s1 = int_to_ptr.vmem [resolvable:$true] %s190_s1 }
   0x7   :  { %v27_v8 = vrot.slane %v26_v6, 2  ;;  %v34_v9 = vrot.slane %v33_v7, 2  ;;  %209 = vmatprep.subr.mxu0 %v245_v31  ;;  %v199_v45 = vld [vmem:[%s316_s2] ss:$0 sm:$0xff]  ;;  %s223_s2 = scalar_lea.vmem %s191_s1, 32  ;;  %p228_p1 = scmp.lt.s32.totalorder %s191_s1, %s191_s1 }
   0x8   :  { %210 = vmatpush3.msra.mxu0 %v97_v32  ;;  %v200_v50 = vld [vmem:[%s318_s4] ss:$0 sm:$0xff]  ;;  %p224_p0 = scmp.ne.s32.totalorder %s191_s1, %s223_s2  ;;  %p229_p2 = scmp.lt.s32.totalorder %s223_s2, %s223_s2 }
   0x9   :  { %v28_v10 = vadd.f32 %v27_v8, %v26_v6  ;;  %v35_v11 = vadd.f32 %v34_v9, %v33_v7  ;;  %211 = vmatprep.subr.mxu0 %v245_v31 }
   0xa   :  { %212 = vmatpush3.msra.mxu0 %v96_v33  ;;  %p230_p3 = por %p229_p2, %p228_p1 }
   0xb   :  { %v29_v12 = vrot.slane %v28_v10, 1  ;;  %v36_v13 = vrot.slane %v35_v11, 1  ;;  %213 = vmatprep.subr.mxu0 %v245_v31 }
   0xc   :  { %214 = vmatpush3.msra.mxu0 %v95_v34  ;;  %p231_p4 = pnand %p230_p3, %p224_p0 }
   0xd   :  { %v30_v14 = vadd.f32 %v29_v12, %v28_v10  ;;  %v37_v15 = vadd.f32 %v36_v13, %v35_v11 }
   0xf   :  { %v39_v16 = vmul.f32 0.125, %v30_v14  ;;  %v40_v17 = vmul.f32 0.125, %v37_v15 }
  0x11   :  { %v44_v18 = vsel %vm43_vm1, %v40_v17, %v39_v16 }
  0x12   :  { %v47_v19 = vsel %vm46_vm2, %v44_v18, 0.0 }
  0x13   :  { %48 = vadd.xlane.f32.xlu0 %v47_v19 }
  0x9c   :  { %v49_v20 = vpop.xlane.xlu0 %48 }
  0x9d   :  { %v51_v21 = vmul.f32 0.03125, %v49_v20 }
  0x9f   :  { %v53_v22 = vrot.slane %v51_v21, 1  ;;  %v56_v23 = vsub.f32 %v39_v16, %v51_v21 }
  0xa1   :  { %v57_v24 = vsub.f32 %v40_v17, %v53_v22  ;;  %v58_v26 = vmul.f32 %v56_v23, %v56_v23 }
  0xa3   :  { %v59_v25 = vmul.f32 %v57_v24, %v57_v24 }
  0xa5   :  { %v62_v27 = vrot.slane %v59_v25, 7 }
  0xa7   :  { %v63_v28 = vsel %vm43_vm1, %v62_v27, %v58_v26 }
  0xa8   :  { %v65_v29 = vsel %vm46_vm2, %v63_v28, 0.0 }
  0xa9   :  { %66 = vadd.xlane.f32.xlu0 %v65_v29 }
 0x132   :  { %v67_v35 = vpop.xlane.xlu0 %66 }
 0x133   :  { %v68_v36 = vmul.f32 0.03125, %v67_v35 }
 0x135   :  { %v69_v37 = vadd.f32 1e-05, %v68_v36 }
 0x137   :  { %221 = vrsqrt.f32 %v69_v37 }
 0x144   :  { %v222_v38 = vpop.eup %221 }
 0x145   :  { %v72_v39 = vrot.slane %v222_v38, 1  ;;  %v75_v40 = vmul.f32 %v222_v38, %v56_v23 }
 0x147   :  { %v76_v42 = vmul.f32 %v72_v39, %v57_v24  ;;  %v84_v43 = vmul.f32 %v198_v41, %v75_v40 }
 0x149   :  { %v85_v44 = vmul.f32 %v198_v41, %v76_v42  ;;  %v93_v47 = vadd.f32 %v199_v45, %v84_v43 }
 0x14b   :  { %v94_v46 = vadd.f32 %v199_v45, %v85_v44 }
 0x14d   :  { %v108_v48 = vrot.slane %v94_v46, 7 }
 0x14f   :  { %v109_v49 = vsel %vm43_vm1, %v108_v48, %v93_v47 }
 0x150   :  { %216 = vmatmul.mubr.msk.f32.vlgmr.msra.gmra.mxu0 %vm23_vm0, %v109_v49 }
 0x210   :  { %v178_v51 = vpop.f32.mrf.mxu0 }
 0x211   :  { %v179_v52 = vadd.f32 %v200_v50, %v178_v51 }
 0x212   :  { %v217_v53 = vpop.f32.mrf.mxu0 }
 0x213   :  { %183 = vst.msk [vmem:[#allocation2] sm:$0x3] %vm182_vm4, %v179_v52 }
 0x214   :  { %234 = shalt.err (!%p231_p4)
}
 0x215   :  { %193 = dma.vmem_to_hbm [thread:$0]  %s191_s1, 32, %s319_s5, [#allocation3]  }
 0x216   :  { %243 = dma.done.wait [#allocation3], 32  }
 0x217   :  { %244 = vsyncadd [#allocation3], 4294967264 }
 0x218   :  { %197 = vsyncpa [#allocation3], 1 }

</bundles_post_ra>
